<compile_context>
chip_gen: v5e
topology: v5e:2x2
jax: 0.10.0
libtpu: 0.0.40
codegen_flags: <defaults>
</compile_context>

<pallas_src>
import functools

import jax
import jax.numpy as jnp
from jax import lax
from jax.experimental import pallas as pl
from jax.experimental.pallas import tpu as pltpu


# Packed per-(image, component) coefficient layout (9 entries per component):
#   0: mu_x   1: mu_y   2: 1/sigma_x   3: 1/sigma_y
#   4: -1/(2*(1-rho^2))   5: rho/(1-rho^2)
#   6: pi     7: pi*scale 8: pi*scale*color
_NCOEF = 9


def _anomaly_kernel(coef_ref, xk_ref, yk_ref, img_ref, imgA_ref, alpha_ref, *, nb):
    """One grid step processes `nb` images, each stored lane-dense as (C, HW).

    coef_ref : (nb, K, 9) f32 VMEM   packed per-component coefficient table
    xk_ref   : (K, HW)    f32 VMEM   x pixel-centre coords, broadcast over K
    yk_ref   : (K, HW)    f32 VMEM   y pixel-centre coords, broadcast over K
    img_ref  : (nb, C, HW)           input images
    imgA_ref : (nb, C, HW)           anomalous images (output)
    alpha_ref: (nb, 1, HW) f32       1 - mask (output)
    """
    # Hoisted once per grid step; JAX does not CSE broadcasts inside loops.
    xk = xk_ref[...]                       # (K, HW)
    yk = yk_ref[...]                       # (K, HW)

    def body(b, carry):
        c = coef_ref[b]                    # (K, 9) f32
        mux, muy = c[:, 0:1], c[:, 1:2]
        isx, isy = c[:, 2:3], c[:, 3:4]
        nid, rov = c[:, 4:5], c[:, 5:6]    # -1/(2(1-rho^2)), rho/(1-rho^2)
        w0, w1, w2 = c[:, 6:7], c[:, 7:8], c[:, 8:9]

        # All K components at once: (K, HW) arrays fill full (8,128) vregs.
        zx = (xk - mux) * isx
        zy = (yk - muy) * isy
        # == -(zx^2 - 2*rho*zx*zy + zy^2) / (2*(1 - rho^2))
        expo = (zx * zx + zy * zy) * nid + (zx * zy) * rov
        f = jnp.exp(expo)                  # (K, HW), EUP

        # Weighted sublane (XLU) reductions over the K axis.
        s_prob = jnp.sum(f * w0, axis=0, keepdims=True)    # sum_k pi_k f_k
        s_alpha = jnp.sum(f * w1, axis=0, keepdims=True)   # ... * scale_k
        s_col = jnp.sum(f * w2, axis=0, keepdims=True)     # ... * color_k

        # Per-image normaliser: exact reciprocal of the max over the image.
        inv_max = 1.0 / jnp.max(s_prob)
        alpha = s_alpha * inv_max          # == 1 - mask; reused for both outs
        mask = 1.0 - alpha
        noise = s_col * inv_max

        img = img_ref[b].astype(jnp.float32)                 # (C, HW)
        imgA_ref[b] = (img * mask + noise).astype(imgA_ref.dtype)
        alpha_ref[b] = alpha.astype(alpha_ref.dtype)         # (1, HW)
        return carry

    lax.fori_loop(0, nb, body, 0, unroll=(nb <= 4))


def _vmem_capacity_bytes():
    try:
        return int(pltpu.get_tpu_info().vmem_capacity_bytes)
    except Exception:
        return 64 * 1024 * 1024            # conservative default (v7x)


def _pick_images_per_block(N, C, HW, K, itemsize, vmem_cap):
    """Images per grid step.

    Large enough to amortise the ~0.35us/step grid overhead, small enough to
    double-buffer comfortably in VMEM.  Split into >=2 grid steps only when
    per-step mixture work is big enough to hide the extra step overhead, so
    tiny workloads run as one step even on 2-TC chips and single-TC chips
    (v5e/v6e) never pay for a pointless split.
    """
    per_image_bytes = (2 * C + 1) * HW * max(int(itemsize), 4)   # in+out+alpha
    budget = max(vmem_cap // 4, 2 * 1024 * 1024)   # headroom for 2x buffering
    nb = min(N, max(1, budget // per_image_bytes))
    per_step_work = nb * K * HW                    # densified mixture elements
    if N >= 2 and per_step_work >= (1 << 20):      # ~>0.5us of vector work
        nb = min(nb, (N + 1) // 2)                 # allow >=2 parallel steps
    return max(nb, 1)


def constant_anomaly_forward(imageN, gmm_params):
    """imageN: (N, C, H, W); gmm_params: 8-tuple of (N,1,1,1,K) arrays.

    Returns (imageA, 1 - mask) with shapes (N, C, H, W) and (N, 1, H, W),
    matching ConstantAnomalyGenerator.forward.
    """
    color, mu_x, mu_y, sigma_x, sigma_y, rho, pi, scale = gmm_params
    N, C, H, W = imageN.shape
    K = mu_x.shape[-1]
    HW = H * W
    assert H > 1 and W > 1, "H and W must be > 1 (coords use H-1, W-1)"

    f32 = jnp.float32
    flat = lambda p: p.reshape(N, K).astype(f32)
    mux, muy, sx, sy, r, pi_, sc, col = map(
        flat, (mu_x, mu_y, sigma_x, sigma_y, rho, pi, scale, color))

    # Scalar-side precompute on tiny (N, K) arrays: removes per-pixel vector
    # divides and redundant multiplies from the kernel's inner math.
    one_m_r2 = 1.0 - r * r
    coef = jnp.stack(
        [mux, muy, 1.0 / sx, 1.0 / sy, -0.5 / one_m_r2, r / one_m_r2,
         pi_, pi_ * sc, pi_ * sc * col],
        axis=-1)                                             # (N, K, 9)

    # Pixel-centre coordinates, flattened row-major (flat index i = h*W + w),
    # pre-broadcast over the K (sublane) axis so the kernel never broadcasts.
    xs = jnp.arange(W, dtype=f32) / (W - 1) * 2.0 - 1.0
    ys = jnp.arange(H, dtype=f32) / (H - 1) * 2.0 - 1.0
    x_flat = jnp.tile(xs, (H,))                              # (HW,)
    y_flat = jnp.repeat(ys, W)                               # (HW,)
    xk = jnp.broadcast_to(x_flat[None, :], (K, HW))
    yk = jnp.broadcast_to(y_flat[None, :], (K, HW))

    img_flat = imageN.reshape(N, C, HW)                      # free reshape

    vmem_cap = _vmem_capacity_bytes()
    nb = _pick_images_per_block(N, C, HW, K, img_flat.dtype.itemsize, vmem_cap)

    # Pad N to a multiple of nb (edge-padded coefficients keep the padded
    # rows numerically benign); outputs are sliced back afterwards.
    n_steps = pl.cdiv(N, nb)
    N_pad = n_steps * nb
    if N_pad != N:
        pad = N_pad - N
        img_flat = jnp.pad(img_flat, ((0, pad), (0, 0), (0, 0)))
        coef = jnp.pad(coef, ((0, pad), (0, 0), (0, 0)), mode="edge")

    kernel = functools.partial(_anomaly_kernel, nb=nb)
    vmem_limit = max(16 * 1024 * 1024, min(vmem_cap, 128 * 1024 * 1024) // 2)

    imageA_flat, alpha_flat = pl.pallas_call(
        kernel,
        out_shape=(jax.ShapeDtypeStruct((N_pad, C, HW), imageN.dtype),
                   jax.ShapeDtypeStruct((N_pad, 1, HW), f32)),
        grid_spec=pltpu.PrefetchScalarGridSpec(
            num_scalar_prefetch=0,
            grid=(n_steps,),
            in_specs=[
                # Packed per-component coefficient table (VMEM).
                pl.BlockSpec((nb, K, _NCOEF), lambda i: (i, 0, 0)),
                # Constant coordinate tables: fetched once, stay resident.
                pl.BlockSpec((K, HW), lambda i: (0, 0)),
                pl.BlockSpec((K, HW), lambda i: (0, 0)),
                pl.BlockSpec((nb, C, HW), lambda i: (i, 0, 0)),
            ],
            out_specs=(
                pl.BlockSpec((nb, C, HW), lambda i: (i, 0, 0)),
                pl.BlockSpec((nb, 1, HW), lambda i: (i, 0, 0)),
            ),
        ),
        compiler_params=pltpu.CompilerParams(
            dimension_semantics=("parallel",),
            vmem_limit_bytes=int(vmem_limit),
        ),
    )(coef, xk, yk, img_flat)

    imageA = imageA_flat[:N].reshape(N, C, H, W)
    one_minus_mask = alpha_flat[:N].reshape(N, 1, H, W)
    return imageA, one_minus_mask


def _reference_forward(imageN, gmm_params):
    # Pure-JAX transcription of the PyTorch code (for correctness check).
    color, mu_x, mu_y, sigma_x, sigma_y, rho, pi, scale = gmm_params
    N, C, H, W = imageN.shape
    x = (jnp.arange(W, dtype=jnp.float32) / (W - 1) * 2.0 - 1.0
         ).reshape(1, 1, 1, W, 1)
    y = (jnp.arange(H, dtype=jnp.float32) / (H - 1) * 2.0 - 1.0
         ).reshape(1, 1, H, 1, 1)
    z_x = (x - mu_x) / sigma_x
    z_y = (y - mu_y) / sigma_y
    f_xy = jnp.exp(-(z_x * z_x - 2.0 * rho * z_x * z_y + z_y * z_y)
                   / (2.0 * (1.0 - rho * rho)))
    gauss_prob = f_xy * pi
    gmm_prob = gauss_prob.sum(-1)
    gmm_prob_max = gmm_prob.reshape(N, -1).max(-1).reshape(N, 1, 1, 1, 1)
    norm_gauss_prob = gauss_prob / gmm_prob_max * scale
    mask = 1.0 - norm_gauss_prob.sum(-1)
    noise = (norm_gauss_prob * color).sum(-1)
    imageA = imageN * mask + noise
    return imageA, 1.0 - mask


if __name__ == "__main__":
    key = jax.random.PRNGKey(0)
    N, C, H, W, K = 2, 3, 16, 16, 8

    ks = jax.random.split(key, 9)
    imageN = jax.random.uniform(ks[0], (N, C, H, W), jnp.float32,
                                minval=-1.0, maxval=1.0)

    def p(k, lo, hi):
        return jax.random.uniform(k, (N, 1, 1, 1, K), jnp.float32,
                                  minval=lo, maxval=hi)

    color = p(ks[1], -1.0, 1.0)
    mu_x = p(ks[2], -0.8, 0.8)
    mu_y = p(ks[3], -0.8, 0.8)
    sigma_x = p(ks[4], 0.2, 0.6)
    sigma_y = p(ks[5], 0.2, 0.6)
    rho = p(ks[6], -0.5, 0.5)
    pi = p(ks[7], 0.1, 1.0)
    scale = p(ks[8], 0.5, 1.0)

    gmm_params = (color, mu_x, mu_y, sigma_x, sigma_y, rho, pi, scale)

    imageA, one_minus_mask = constant_anomaly_forward(imageN, gmm_params)
    jax.block_until_ready((imageA, one_minus_mask))

    refA, ref_omm = _reference_forward(imageN, gmm_params)
    assert imageA.shape == (N, C, H, W) and one_minus_mask.shape == (N, 1, H, W)
    assert jnp.allclose(imageA, refA, rtol=1e-5, atol=1e-5), \
        float(jnp.max(jnp.abs(imageA - refA)))
    assert jnp.allclose(one_minus_mask, ref_omm, rtol=1e-5, atol=1e-5), \
        float(jnp.max(jnp.abs(one_minus_mask - ref_omm)))

    print("KERNEL_OK")
</pallas_src>

<mosaic_0001>
module attributes {stable_mosaic.version = 11 : i64} {
  func.func @_anomaly_kernel(%arg0: i32, %arg1: memref<2x8x9xf32, #tpu.memory_space<vmem>>, %arg2: memref<8x256xf32, #tpu.memory_space<vmem>>, %arg3: memref<8x256xf32, #tpu.memory_space<vmem>>, %arg4: memref<2x3x256xf32, #tpu.memory_space<vmem>>, %arg5: memref<2x3x256xf32, #tpu.memory_space<vmem>>, %arg6: memref<2x1x256xf32, #tpu.memory_space<vmem>>) attributes {dimension_semantics = [#tpu.dimension_semantics<parallel>], iteration_bounds = array<i64: 1>, scalar_prefetch = 0 : i64, scratch_operands = 0 : i64, tpu.core_type = #tpu.core_type<tc>, window_params = [{transform_indices = @transform_0, window_bounds = array<i64: 2, 8, 9>}, {pipeline_mode = #tpu.pipeline_mode<synchronous>, transform_indices = @transform_1, window_bounds = array<i64: 8, 256>}, {pipeline_mode = #tpu.pipeline_mode<synchronous>, transform_indices = @transform_2, window_bounds = array<i64: 8, 256>}, {transform_indices = @transform_3, window_bounds = array<i64: 2, 3, 256>}, {transform_indices = @transform_4, window_bounds = array<i64: 2, 3, 256>}, {transform_indices = @transform_5, window_bounds = array<i64: 2, 1, 256>}]} {
    %c0 = arith.constant 0 : index
    %c0_0 = arith.constant 0 : index
    %0 = vector.load %arg2[%c0, %c0_0] : memref<8x256xf32, #tpu.memory_space<vmem>>, vector<8x256xf32>
    %c0_1 = arith.constant 0 : index
    %c0_2 = arith.constant 0 : index
    %1 = vector.load %arg3[%c0_1, %c0_2] : memref<8x256xf32, #tpu.memory_space<vmem>>, vector<8x256xf32>
    %c0_i32 = arith.constant 0 : i32
    %2 = arith.index_cast %c0_i32 : i32 to index
    %c0_3 = arith.constant 0 : index
    %c0_4 = arith.constant 0 : index
    %3 = vector.load %arg1[%2, %c0_3, %c0_4] : memref<2x8x9xf32, #tpu.memory_space<vmem>>, vector<1x8x9xf32>
    %4 = vector.shape_cast %3 : vector<1x8x9xf32> to vector<8x9xf32>
    %5 = vector.extract_strided_slice %4 {offsets = [0, 0], sizes = [8, 1], strides = [1, 1]} : vector<8x9xf32> to vector<8x1xf32>
    %6 = vector.extract_strided_slice %4 {offsets = [0, 1], sizes = [8, 1], strides = [1, 1]} : vector<8x9xf32> to vector<8x1xf32>
    %7 = vector.extract_strided_slice %4 {offsets = [0, 2], sizes = [8, 1], strides = [1, 1]} : vector<8x9xf32> to vector<8x1xf32>
    %8 = vector.extract_strided_slice %4 {offsets = [0, 3], sizes = [8, 1], strides = [1, 1]} : vector<8x9xf32> to vector<8x1xf32>
    %9 = vector.extract_strided_slice %4 {offsets = [0, 4], sizes = [8, 1], strides = [1, 1]} : vector<8x9xf32> to vector<8x1xf32>
    %10 = vector.extract_strided_slice %4 {offsets = [0, 5], sizes = [8, 1], strides = [1, 1]} : vector<8x9xf32> to vector<8x1xf32>
    %11 = vector.extract_strided_slice %4 {offsets = [0, 6], sizes = [8, 1], strides = [1, 1]} : vector<8x9xf32> to vector<8x1xf32>
    %12 = vector.extract_strided_slice %4 {offsets = [0, 7], sizes = [8, 1], strides = [1, 1]} : vector<8x9xf32> to vector<8x1xf32>
    %13 = vector.extract_strided_slice %4 {offsets = [0, 8], sizes = [8, 1], strides = [1, 1]} : vector<8x9xf32> to vector<8x1xf32>
    %14 = vector.broadcast %5 : vector<8x1xf32> to vector<8x256xf32>
    %15 = arith.subf %0, %14 : vector<8x256xf32>
    %16 = vector.broadcast %7 : vector<8x1xf32> to vector<8x256xf32>
    %17 = arith.mulf %15, %16 : vector<8x256xf32>
    %18 = vector.broadcast %6 : vector<8x1xf32> to vector<8x256xf32>
    %19 = arith.subf %1, %18 : vector<8x256xf32>
    %20 = vector.broadcast %8 : vector<8x1xf32> to vector<8x256xf32>
    %21 = arith.mulf %19, %20 : vector<8x256xf32>
    %22 = arith.mulf %17, %17 : vector<8x256xf32>
    %23 = arith.mulf %21, %21 : vector<8x256xf32>
    %24 = arith.addf %22, %23 : vector<8x256xf32>
    %25 = vector.broadcast %9 : vector<8x1xf32> to vector<8x256xf32>
    %26 = arith.mulf %24, %25 : vector<8x256xf32>
    %27 = arith.mulf %17, %21 : vector<8x256xf32>
    %28 = vector.broadcast %10 : vector<8x1xf32> to vector<8x256xf32>
    %29 = arith.mulf %27, %28 : vector<8x256xf32>
    %30 = arith.addf %26, %29 : vector<8x256xf32>
    %31 = math.exp %30 : vector<8x256xf32>
    %32 = vector.broadcast %11 : vector<8x1xf32> to vector<8x256xf32>
    %33 = arith.mulf %31, %32 : vector<8x256xf32>
    %cst = arith.constant dense<0.000000e+00> : vector<256xf32>
    %34 = vector.multi_reduction <add>, %33, %cst [0] : vector<8x256xf32> to vector<256xf32>
    %35 = vector.shape_cast %34 : vector<256xf32> to vector<1x256xf32>
    %36 = vector.broadcast %12 : vector<8x1xf32> to vector<8x256xf32>
    %37 = arith.mulf %31, %36 : vector<8x256xf32>
    %cst_5 = arith.constant dense<0.000000e+00> : vector<256xf32>
    %38 = vector.multi_reduction <add>, %37, %cst_5 [0] : vector<8x256xf32> to vector<256xf32>
    %39 = vector.shape_cast %38 : vector<256xf32> to vector<1x256xf32>
    %40 = vector.broadcast %13 : vector<8x1xf32> to vector<8x256xf32>
    %41 = arith.mulf %31, %40 : vector<8x256xf32>
    %cst_6 = arith.constant dense<0.000000e+00> : vector<256xf32>
    %42 = vector.multi_reduction <add>, %41, %cst_6 [0] : vector<8x256xf32> to vector<256xf32>
    %43 = vector.shape_cast %42 : vector<256xf32> to vector<1x256xf32>
    %44 = vector.shape_cast %35 : vector<1x256xf32> to vector<1x1x256xf32>
    %cst_7 = arith.constant dense<0xFF800000> : vector<1xf32>
    %45 = vector.multi_reduction <maximumf>, %44, %cst_7 [1, 2] : vector<1x1x256xf32> to vector<1xf32>
    %46 = vector.shape_cast %45 : vector<1xf32> to vector<1x1x1xf32>
    %47 = vector.extract %46[0, 0, 0] : f32 from vector<1x1x1xf32>
    %cst_8 = arith.constant 1.000000e+00 : f32
    %48 = arith.divf %cst_8, %47 : f32
    %49 = vector.broadcast %48 : f32 to vector<1x256xf32>
    %50 = arith.mulf %39, %49 : vector<1x256xf32>
    %cst_9 = arith.constant 1.000000e+00 : f32
    %51 = vector.broadcast %cst_9 : f32 to vector<1x256xf32>
    %52 = arith.subf %51, %50 : vector<1x256xf32>
    %53 = vector.broadcast %48 : f32 to vector<1x256xf32>
    %54 = arith.mulf %43, %53 : vector<1x256xf32>
    %55 = arith.index_cast %c0_i32 : i32 to index
    %c0_10 = arith.constant 0 : index
    %c0_11 = arith.constant 0 : index
    %56 = vector.load %arg4[%55, %c0_10, %c0_11] : memref<2x3x256xf32, #tpu.memory_space<vmem>>, vector<1x3x256xf32>
    %57 = vector.shape_cast %56 : vector<1x3x256xf32> to vector<3x256xf32>
    %58 = vector.broadcast %52 : vector<1x256xf32> to vector<3x256xf32>
    %59 = arith.mulf %57, %58 : vector<3x256xf32>
    %60 = vector.broadcast %54 : vector<1x256xf32> to vector<3x256xf32>
    %61 = arith.addf %59, %60 : vector<3x256xf32>
    %62 = arith.index_cast %c0_i32 : i32 to index
    %c0_12 = arith.constant 0 : index
    %c0_13 = arith.constant 0 : index
    %63 = vector.load %arg5[%62, %c0_12, %c0_13] : memref<2x3x256xf32, #tpu.memory_space<vmem>>, vector<1x3x256xf32>
    %64 = vector.shape_cast %63 : vector<1x3x256xf32> to vector<3x256xf32>
    %65 = vector.shape_cast %61 : vector<3x256xf32> to vector<1x3x256xf32>
    tpu.vector_store %arg5[%62, %c0_12, %c0_13], %65 {strides = array<i32>} : memref<2x3x256xf32, #tpu.memory_space<vmem>>, vector<1x3x256xf32>,
    %66 = arith.index_cast %c0_i32 : i32 to index
    %c0_14 = arith.constant 0 : index
    %c0_15 = arith.constant 0 : index
    %67 = vector.load %arg6[%66, %c0_14, %c0_15] : memref<2x1x256xf32, #tpu.memory_space<vmem>>, vector<1x1x256xf32>
    %68 = vector.shape_cast %67 : vector<1x1x256xf32> to vector<1x256xf32>
    %69 = vector.shape_cast %50 : vector<1x256xf32> to vector<1x1x256xf32>
    tpu.vector_store %arg6[%66, %c0_14, %c0_15], %69 {strides = array<i32>} : memref<2x1x256xf32, #tpu.memory_space<vmem>>, vector<1x1x256xf32>,
    %c1_i32 = arith.constant 1 : i32
    %70 = arith.index_cast %c1_i32 : i32 to index
    %c0_16 = arith.constant 0 : index
    %c0_17 = arith.constant 0 : index
    %71 = vector.load %arg1[%70, %c0_16, %c0_17] : memref<2x8x9xf32, #tpu.memory_space<vmem>>, vector<1x8x9xf32>
    %72 = vector.shape_cast %71 : vector<1x8x9xf32> to vector<8x9xf32>
    %73 = vector.extract_strided_slice %72 {offsets = [0, 0], sizes = [8, 1], strides = [1, 1]} : vector<8x9xf32> to vector<8x1xf32>
    %74 = vector.extract_strided_slice %72 {offsets = [0, 1], sizes = [8, 1], strides = [1, 1]} : vector<8x9xf32> to vector<8x1xf32>
    %75 = vector.extract_strided_slice %72 {offsets = [0, 2], sizes = [8, 1], strides = [1, 1]} : vector<8x9xf32> to vector<8x1xf32>
    %76 = vector.extract_strided_slice %72 {offsets = [0, 3], sizes = [8, 1], strides = [1, 1]} : vector<8x9xf32> to vector<8x1xf32>
    %77 = vector.extract_strided_slice %72 {offsets = [0, 4], sizes = [8, 1], strides = [1, 1]} : vector<8x9xf32> to vector<8x1xf32>
    %78 = vector.extract_strided_slice %72 {offsets = [0, 5], sizes = [8, 1], strides = [1, 1]} : vector<8x9xf32> to vector<8x1xf32>
    %79 = vector.extract_strided_slice %72 {offsets = [0, 6], sizes = [8, 1], strides = [1, 1]} : vector<8x9xf32> to vector<8x1xf32>
    %80 = vector.extract_strided_slice %72 {offsets = [0, 7], sizes = [8, 1], strides = [1, 1]} : vector<8x9xf32> to vector<8x1xf32>
    %81 = vector.extract_strided_slice %72 {offsets = [0, 8], sizes = [8, 1], strides = [1, 1]} : vector<8x9xf32> to vector<8x1xf32>
    %82 = vector.broadcast %73 : vector<8x1xf32> to vector<8x256xf32>
    %83 = arith.subf %0, %82 : vector<8x256xf32>
    %84 = vector.broadcast %75 : vector<8x1xf32> to vector<8x256xf32>
    %85 = arith.mulf %83, %84 : vector<8x256xf32>
    %86 = vector.broadcast %74 : vector<8x1xf32> to vector<8x256xf32>
    %87 = arith.subf %1, %86 : vector<8x256xf32>
    %88 = vector.broadcast %76 : vector<8x1xf32> to vector<8x256xf32>
    %89 = arith.mulf %87, %88 : vector<8x256xf32>
    %90 = arith.mulf %85, %85 : vector<8x256xf32>
    %91 = arith.mulf %89, %89 : vector<8x256xf32>
    %92 = arith.addf %90, %91 : vector<8x256xf32>
    %93 = vector.broadcast %77 : vector<8x1xf32> to vector<8x256xf32>
    %94 = arith.mulf %92, %93 : vector<8x256xf32>
    %95 = arith.mulf %85, %89 : vector<8x256xf32>
    %96 = vector.broadcast %78 : vector<8x1xf32> to vector<8x256xf32>
    %97 = arith.mulf %95, %96 : vector<8x256xf32>
    %98 = arith.addf %94, %97 : vector<8x256xf32>
    %99 = math.exp %98 : vector<8x256xf32>
    %100 = vector.broadcast %79 : vector<8x1xf32> to vector<8x256xf32>
    %101 = arith.mulf %99, %100 : vector<8x256xf32>
    %cst_18 = arith.constant dense<0.000000e+00> : vector<256xf32>
    %102 = vector.multi_reduction <add>, %101, %cst_18 [0] : vector<8x256xf32> to vector<256xf32>
    %103 = vector.shape_cast %102 : vector<256xf32> to vector<1x256xf32>
    %104 = vector.broadcast %80 : vector<8x1xf32> to vector<8x256xf32>
    %105 = arith.mulf %99, %104 : vector<8x256xf32>
    %cst_19 = arith.constant dense<0.000000e+00> : vector<256xf32>
    %106 = vector.multi_reduction <add>, %105, %cst_19 [0] : vector<8x256xf32> to vector<256xf32>
    %107 = vector.shape_cast %106 : vector<256xf32> to vector<1x256xf32>
    %108 = vector.broadcast %81 : vector<8x1xf32> to vector<8x256xf32>
    %109 = arith.mulf %99, %108 : vector<8x256xf32>
    %cst_20 = arith.constant dense<0.000000e+00> : vector<256xf32>
    %110 = vector.multi_reduction <add>, %109, %cst_20 [0] : vector<8x256xf32> to vector<256xf32>
    %111 = vector.shape_cast %110 : vector<256xf32> to vector<1x256xf32>
    %112 = vector.shape_cast %103 : vector<1x256xf32> to vector<1x1x256xf32>
    %cst_21 = arith.constant dense<0xFF800000> : vector<1xf32>
    %113 = vector.multi_reduction <maximumf>, %112, %cst_21 [1, 2] : vector<1x1x256xf32> to vector<1xf32>
    %114 = vector.shape_cast %113 : vector<1xf32> to vector<1x1x1xf32>
    %115 = vector.extract %114[0, 0, 0] : f32 from vector<1x1x1xf32>
    %cst_22 = arith.constant 1.000000e+00 : f32
    %116 = arith.divf %cst_22, %115 : f32
    %117 = vector.broadcast %116 : f32 to vector<1x256xf32>
    %118 = arith.mulf %107, %117 : vector<1x256xf32>
    %cst_23 = arith.constant 1.000000e+00 : f32
    %119 = vector.broadcast %cst_23 : f32 to vector<1x256xf32>
    %120 = arith.subf %119, %118 : vector<1x256xf32>
    %121 = vector.broadcast %116 : f32 to vector<1x256xf32>
    %122 = arith.mulf %111, %121 : vector<1x256xf32>
    %123 = arith.index_cast %c1_i32 : i32 to index
    %c0_24 = arith.constant 0 : index
    %c0_25 = arith.constant 0 : index
    %124 = vector.load %arg4[%123, %c0_24, %c0_25] : memref<2x3x256xf32, #tpu.memory_space<vmem>>, vector<1x3x256xf32>
    %125 = vector.shape_cast %124 : vector<1x3x256xf32> to vector<3x256xf32>
    %126 = vector.broadcast %120 : vector<1x256xf32> to vector<3x256xf32>
    %127 = arith.mulf %125, %126 : vector<3x256xf32>
    %128 = vector.broadcast %122 : vector<1x256xf32> to vector<3x256xf32>
    %129 = arith.addf %127, %128 : vector<3x256xf32>
    %130 = arith.index_cast %c1_i32 : i32 to index
    %c0_26 = arith.constant 0 : index
    %c0_27 = arith.constant 0 : index
    %131 = vector.load %arg5[%130, %c0_26, %c0_27] : memref<2x3x256xf32, #tpu.memory_space<vmem>>, vector<1x3x256xf32>
    %132 = vector.shape_cast %131 : vector<1x3x256xf32> to vector<3x256xf32>
    %133 = vector.shape_cast %129 : vector<3x256xf32> to vector<1x3x256xf32>
    tpu.vector_store %arg5[%130, %c0_26, %c0_27], %133 {strides = array<i32>} : memref<2x3x256xf32, #tpu.memory_space<vmem>>, vector<1x3x256xf32>,
    %134 = arith.index_cast %c1_i32 : i32 to index
    %c0_28 = arith.constant 0 : index
    %c0_29 = arith.constant 0 : index
    %135 = vector.load %arg6[%134, %c0_28, %c0_29] : memref<2x1x256xf32, #tpu.memory_space<vmem>>, vector<1x1x256xf32>
    %136 = vector.shape_cast %135 : vector<1x1x256xf32> to vector<1x256xf32>
    %137 = vector.shape_cast %118 : vector<1x256xf32> to vector<1x1x256xf32>
    tpu.vector_store %arg6[%134, %c0_28, %c0_29], %137 {strides = array<i32>} : memref<2x1x256xf32, #tpu.memory_space<vmem>>, vector<1x1x256xf32>,
    %c2_i32 = arith.constant 2 : i32
    return
  }
  func.func @transform_0(%arg0: i32) -> (i32, i32, i32) {
    %c0_i32 = arith.constant 0 : i32
    %c0_i32_0 = arith.constant 0 : i32
    %c0_i32_1 = arith.constant 0 : i32
    return %arg0, %c0_i32, %c0_i32_0 : i32, i32, i32
  }
  func.func @transform_1(%arg0: i32) -> (i32, i32) {
    %c0_i32 = arith.constant 0 : i32
    %c0_i32_0 = arith.constant 0 : i32
    %c0_i32_1 = arith.constant 0 : i32
    return %c0_i32, %c0_i32_0 : i32, i32
  }
  func.func @transform_2(%arg0: i32) -> (i32, i32) {
    %c0_i32 = arith.constant 0 : i32
    %c0_i32_0 = arith.constant 0 : i32
    %c0_i32_1 = arith.constant 0 : i32
    return %c0_i32, %c0_i32_0 : i32, i32
  }
  func.func @transform_3(%arg0: i32) -> (i32, i32, i32) {
    %c0_i32 = arith.constant 0 : i32
    %c0_i32_0 = arith.constant 0 : i32
    %c0_i32_1 = arith.constant 0 : i32
    return %arg0, %c0_i32, %c0_i32_0 : i32, i32, i32
  }
  func.func @transform_4(%arg0: i32) -> (i32, i32, i32) {
    %c0_i32 = arith.constant 0 : i32
    %c0_i32_0 = arith.constant 0 : i32
    %c0_i32_1 = arith.constant 0 : i32
    return %arg0, %c0_i32, %c0_i32_0 : i32, i32, i32
  }
  func.func @transform_5(%arg0: i32) -> (i32, i32, i32) {
    %c0_i32 = arith.constant 0 : i32
    %c0_i32_0 = arith.constant 0 : i32
    %c0_i32_1 = arith.constant 0 : i32
    return %arg0, %c0_i32, %c0_i32_0 : i32, i32, i32
  }
}

</mosaic_0001>

<bundles_post_ra>
// kernel: tpu_custom_call.1
= control target key start
LH: loop header
LB: loop body
LE: loop exit
PB: predicated region body
PF: predicated region fallthrough
CT: control target
= control target key end

     0   :  { %11 = vsyncpa [#allocation3], 0  ;;  %s636_s0 = inlined_call_operand.vmem [shape: f32[2,8,9], index: 0, kind: input, shape index: {}]   ;;  %s637_s1 = inlined_call_operand.hbm [shape: f32[8,256], index: 1, kind: input, shape index: {}]   ;;  %s638_s2 = inlined_call_operand.hbm [shape: f32[8,256], index: 2, kind: input, shape index: {}]   ;;  %s639_s3 = inlined_call_operand.vmem [shape: f32[2,3,256], index: 3, kind: input, shape index: {}]   ;;  %s640_s4 = inlined_call_operand.vmem [shape: f32[2,3,256], index: 4, kind: output, shape index: {0}]   ;;  %s641_s5 = inlined_call_operand.hbm [shape: f32[2,1,256], index: 5, kind: output, shape index: {1}]  }
   0x1   :  { %12 = vsyncpa [#allocation6], 0 }
   0x2   :  { %13 = vsyncpa [#allocation4], 0  ;;  %s21_s20 = sshll.u32 %s637_s1, 4  ;;  %s523_s21 = smov [#allocation2]   ;;  %s22_s20 = int_to_ptr.hbm [resolvable:$true] %s21_s20 }
   0x3   :  { %s23_s22 = sshll.u32 %s523_s21, 4  ;;  %s32_s25 = sshll.u32 %s638_s2, 4  ;;  %s24_s22 = int_to_ptr.vmem [resolvable:$true] %s23_s22  ;;  %s33_s25 = int_to_ptr.hbm [resolvable:$true] %s32_s25 }
   0x4   :  { %26 = dma.hbm_to_vmem [thread:$0]  %s22_s20, 256, %s24_s22, [#allocation3]  }
   0x5   :  { %s524_s26 = smov [#allocation5]  }
   0x6   :  { %s34_s27 = sshll.u32 %s524_s26, 4  ;;  %s35_s27 = int_to_ptr.vmem [resolvable:$true] %s34_s27 }
   0x7   :  { %37 = dma.hbm_to_vmem [thread:$0]  %s33_s25, 256, %s35_s27, [#allocation6]  }
   0x8   :  { %517 = dma.done.wait [#allocation3], 256  }
   0x9   :  { %518 = vsyncadd [#allocation3], 4294967040 }
   0xa   :  { %519 = dma.done.wait [#allocation6], 256  }
   0xb   :  { %520 = vsyncadd [#allocation6], 4294967040  ;;  %v525_v0 = vmov 2   ;;  %v526_v1 = vmov 0   ;;  %v527_v2 = vmov 4   ;;  %v52_v3 = vld [vmem:[%s636_s0] sm:$0xff] }
   0xc   :  { %419 = vset.pattern.permute.xlu1 %v525_v0  ;;  %417 = vset.pattern.permute.xlu0 %v526_v1  ;;  %v528_v4 = vmov 3   ;;  %v529_v5 = vmov 1   ;;  %v530_v6 = vmov 5   ;;  %v392_v7 = vld [vmem:[%s636_s0 + $0x8] sm:$0xff]  ;;  %v531_v8 = vmov 6   ;;  %v48_v14 = vld [vmem:[#allocation2] sm:$0xff] }
   0xd   :  { %421 = vset.pattern.permute.xlu2 %v527_v2  ;;  %61 = vperm.xlu1 %419, %v52_v3   ;;  %v532_v9 = vmov 8   ;;  %v533_v10 = vmov 7   ;;  %v49_v15 = vld [vmem:[#allocation2 + $0x8] sm:$0xff]  ;;  %v50_v19 = vld [vmem:[#allocation5] sm:$0xff]  ;;  %v51_v20 = vld [vmem:[#allocation5 + $0x8] sm:$0xff]  ;;  %vm189_vm4 = vcmask 1043456  }
   0xe   :  { %55 = vperm.xlu0 %417, %v52_v3   ;;  %85 = vperm.xlu2 %421, %v52_v3   ;;  %vm203_vm5 = vcmask 1040384   ;;  %s534_s12 = smov [#allocation7]   ;;  %s376_s16 = sshll.u32 %s641_s5, 4  ;;  %s377_s16 = int_to_ptr.hbm [resolvable:$true] %s376_s16 }
   0xf   :  { %s374_s13 = sshll.u32 %s534_s12, 4  ;;  %s535_s5 = smov 32   ;;  %s375_s13 = int_to_ptr.vmem [resolvable:$true] %s374_s13 }
  0x10   :  { %s536_s19 = smov 2  }
  0x15   :  { %420 = vset.pattern.permute.xlu1 %v528_v4 }
  0x16   :  { %418 = vset.pattern.permute.xlu0 %v529_v5  ;;  %73 = vperm.xlu1 %420, %v52_v3  }
  0x17   :  { %67 = vperm.xlu0 %418, %v52_v3   ;;  %422 = vset.pattern.permute.xlu2 %v530_v6 }
  0x18   :  { %93 = vperm.xlu2 %422, %v52_v3  }
  0x1e   :  { %423 = vset.pattern.permute.xlu1 %v531_v8 }
  0x1f   :  { %227 = vperm.xlu0 %418, %v392_v7   ;;  %105 = vperm.xlu1 %423, %v52_v3  }
  0x20   :  { %424 = vset.pattern.permute.xlu2 %v526_v1 }
  0x21   :  { %215 = vperm.xlu2 %424, %v392_v7  }
  0x27   :  { %425 = vset.pattern.permute.xlu1 %v525_v0  ;;  %432 = vset.pattern.permute.xlu0 %v532_v9 }
  0x28   :  { %221 = vperm.xlu1 %425, %v392_v7  }
  0x29   :  { %426 = vset.pattern.permute.xlu2 %v528_v4 }
  0x2a   :  { %233 = vperm.xlu2 %426, %v392_v7  }
  0x30   :  { %427 = vset.pattern.permute.xlu1 %v527_v2 }
  0x31   :  { %245 = vperm.xlu1 %427, %v392_v7  }
  0x32   :  { %428 = vset.pattern.permute.xlu2 %v530_v6 }
  0x33   :  { %253 = vperm.xlu2 %428, %v392_v7  }
  0x39   :  { %429 = vset.pattern.permute.xlu1 %v531_v8 }
  0x3a   :  { %265 = vperm.xlu1 %429, %v392_v7  }
  0x42   :  { %430 = vset.pattern.permute.xlu1 %v533_v10 }
  0x43   :  { %123 = vperm.xlu1 %430, %v52_v3  }
  0x4b   :  { %283 = vperm.xlu1 %430, %v392_v7  }
  0x53   :  { %431 = vset.pattern.permute.xlu1 %v532_v9 }
  0x54   :  { %141 = vperm.xlu1 %431, %v52_v3  }
  0x5c   :  { %301 = vperm.xlu1 %431, %v392_v7  }
  0x68   :  { %v86_v11 = vpop.permute.xlu2 %85 }
  0x72   :  { %v94_v18 = vpop.permute.xlu2 %93 }
  0x7b   :  { %v216_v35 = vpop.permute.xlu2 %215 }
  0x7c   :  { %v218_v48 = vsub.f32 %v48_v14, %v216_v35  ;;  %v219_v49 = vsub.f32 %v49_v15, %v216_v35 }
  0x7f   :  { %v62_v13 = vpop.permute.xlu1 %61 }
  0x80   :  { %v56_v12 = vpop.permute.xlu0 %55 }
  0x81   :  { %v58_v16 = vsub.f32 %v48_v14, %v56_v12  ;;  %v59_v17 = vsub.f32 %v49_v15, %v56_v12 }
  0x83   :  { %v64_v21 = vmul.f32 %v62_v13, %v58_v16  ;;  %v65_v22 = vmul.f32 %v62_v13, %v59_v17 }
  0x84   :  { %v234_v52 = vpop.permute.xlu2 %233 }
  0x85   :  { %v78_v29 = vmul.f32 %v64_v21, %v64_v21  ;;  %v79_v30 = vmul.f32 %v65_v22, %v65_v22 }
  0x88   :  { %v74_v24 = vpop.permute.xlu1 %73 }
  0x89   :  { %v68_v23 = vpop.permute.xlu0 %67 }
  0x8a   :  { %v70_v25 = vsub.f32 %v50_v19, %v68_v23  ;;  %v71_v26 = vsub.f32 %v51_v20, %v68_v23 }
  0x8c   :  { %v76_v27 = vmul.f32 %v74_v24, %v70_v25  ;;  %v77_v28 = vmul.f32 %v74_v24, %v71_v26 }
  0x8d   :  { %v254_v4 = vpop.permute.xlu2 %253 }
  0x8e   :  { %v80_v31 = vmul.f32 %v76_v27, %v76_v27  ;;  %v81_v32 = vmul.f32 %v77_v28, %v77_v28  ;;  %v90_v33 = vmul.f32 %v76_v27, %v64_v21  ;;  %v91_v34 = vmul.f32 %v77_v28, %v65_v22 }
  0x90   :  { %v82_v36 = vadd.f32 %v80_v31, %v78_v29  ;;  %v83_v37 = vadd.f32 %v81_v32, %v79_v30  ;;  %v96_v40 = vmul.f32 %v94_v18, %v90_v33  ;;  %v97_v41 = vmul.f32 %v94_v18, %v91_v34 }
  0x91   :  { %v106_v42 = vpop.permute.xlu1 %105  ;;  %v228_v47 = vpop.permute.xlu0 %227 }
  0x92   :  { %v88_v38 = vmul.f32 %v86_v11, %v82_v36  ;;  %v89_v39 = vmul.f32 %v86_v11, %v83_v37  ;;  %v230_v50 = vsub.f32 %v50_v19, %v228_v47  ;;  %v231_v51 = vsub.f32 %v51_v20, %v228_v47 }
  0x94   :  { %v98_v43 = vadd.f32 %v96_v40, %v88_v38  ;;  %v99_v44 = vadd.f32 %v97_v41, %v89_v39  ;;  %v236_v56 = vmul.f32 %v234_v52, %v230_v50  ;;  %v237_v57 = vmul.f32 %v234_v52, %v231_v51 }
  0x96   :  { %v100_v45 = vmul.f32 1.442695, %v98_v43  ;;  %v102_v46 = vmul.f32 1.442695, %v99_v44  ;;  %v240_v1 = vmul.f32 %v236_v56, %v236_v56  ;;  %v241_v2 = vmul.f32 %v237_v57, %v237_v57 }
  0x98   :  { %433 = vpow2.f32 %v100_v45 }
  0x99   :  { %435 = vpow2.f32 %v102_v46 }
  0x9a   :  { %v222_v53 = vpop.permute.xlu1 %221 }
  0x9b   :  { %v224_v54 = vmul.f32 %v222_v53, %v218_v48  ;;  %v225_v55 = vmul.f32 %v222_v53, %v219_v49 }
  0x9d   :  { %v238_v61 = vmul.f32 %v224_v54, %v224_v54  ;;  %v239_v62 = vmul.f32 %v225_v55, %v225_v55  ;;  %v250_v0 = vmul.f32 %v236_v56, %v224_v54  ;;  %v251_v5 = vmul.f32 %v237_v57, %v225_v55 }
  0x9e   :  { %v579_v58 = vpop.eup %433 }
  0x9f   :  { %v581_v59 = vpop.eup %435  ;;  %v108_v60 = vmul.f32 %v579_v58, %v106_v42  ;;  %v242_v8 = vadd.f32 %v240_v1, %v238_v61  ;;  %v243_v9 = vadd.f32 %v241_v2, %v239_v62  ;;  %v256_v11 = vmul.f32 %v254_v4, %v250_v0 }
  0xa0   :  { %v109_v63 = vmul.f32 %v581_v59, %v106_v42  ;;  %v257_v14 = vmul.f32 %v254_v4, %v251_v5 }
  0xa1   :  { %v110_v3 = vrot.slane %v108_v60, 4 }
  0xa2   :  { %v116_v6 = vrot.slane %v109_v63, 4 }
  0xa3   :  { %v111_v7 = vadd.f32 %v110_v3, %v108_v60  ;;  %v246_v12 = vpop.permute.xlu1 %245 }
  0xa4   :  { %v117_v10 = vadd.f32 %v116_v6, %v109_v63  ;;  %v248_v15 = vmul.f32 %v246_v12, %v242_v8  ;;  %v249_v16 = vmul.f32 %v246_v12, %v243_v9 }
  0xa5   :  { %v112_v13 = vrot.slane %v111_v7, 2 }
  0xa6   :  { %v118_v17 = vrot.slane %v117_v10, 2  ;;  %v258_v18 = vadd.f32 %v256_v11, %v248_v15  ;;  %v259_v19 = vadd.f32 %v257_v14, %v249_v16 }
  0xa7   :  { %v113_v20 = vadd.f32 %v112_v13, %v111_v7 }
  0xa8   :  { %v119_v21 = vadd.f32 %v118_v17, %v117_v10  ;;  %v260_v22 = vmul.f32 1.442695, %v258_v18  ;;  %v262_v23 = vmul.f32 1.442695, %v259_v19 }
  0xa9   :  { %v114_v24 = vrot.slane %v113_v20, 1 }
  0xaa   :  { %v120_v25 = vrot.slane %v119_v21, 1  ;;  %437 = vpow2.f32 %v260_v22 }
  0xab   :  { %v115_v26 = vadd.f32 %v114_v24, %v113_v20  ;;  %439 = vpow2.f32 %v262_v23 }
  0xac   :  { %v121_v27 = vadd.f32 %v120_v25, %v119_v21  ;;  %v266_v28 = vpop.permute.xlu1 %265  ;;  %v206_v25 = vlaneseq }
  0xae   :  { %v158_v29 = vmax.f32 %v115_v26, %v121_v27  ;;  %vm601_vm6 = vcmp.lt.s32.totalorder %v206_v25, 256 }
  0xb0   :  { %159 = vmax.xlane.f32.xlu0 %v158_v29  ;;  %v585_v30 = vpop.eup %437 }
  0xb1   :  { %v587_v31 = vpop.eup %439  ;;  %v268_v32 = vmul.f32 %v585_v30, %v266_v28 }
  0xb2   :  { %v269_v33 = vmul.f32 %v587_v31, %v266_v28 }
  0xb3   :  { %v270_v34 = vrot.slane %v268_v32, 4 }
  0xb4   :  { %v276_v35 = vrot.slane %v269_v33, 4 }
  0xb5   :  { %v271_v36 = vadd.f32 %v270_v34, %v268_v32  ;;  %v124_v37 = vpop.permute.xlu1 %123 }
  0xb6   :  { %v277_v38 = vadd.f32 %v276_v35, %v269_v33  ;;  %v126_v3 = vmul.f32 %v579_v58, %v124_v37  ;;  %v127_v4 = vmul.f32 %v581_v59, %v124_v37 }
  0xb7   :  { %v272_v39 = vrot.slane %v271_v36, 2 }
  0xb8   :  { %v278_v40 = vrot.slane %v277_v38, 2  ;;  %v128_v7 = vrot.slane %v126_v3, 4  ;;  %v134_v8 = vrot.slane %v127_v4, 4 }
  0xb9   :  { %v273_v41 = vadd.f32 %v272_v39, %v271_v36 }
  0xba   :  { %v279_v42 = vadd.f32 %v278_v40, %v277_v38  ;;  %v129_v11 = vadd.f32 %v128_v7, %v126_v3  ;;  %v135_v12 = vadd.f32 %v134_v8, %v127_v4 }
  0xbb   :  { %v274_v43 = vrot.slane %v273_v41, 1 }
  0xbc   :  { %v280_v44 = vrot.slane %v279_v42, 1  ;;  %v130_v15 = vrot.slane %v129_v11, 2  ;;  %v136_v16 = vrot.slane %v135_v12, 2 }
  0xbd   :  { %v284_v45 = vpop.permute.xlu1 %283  ;;  %v275_v46 = vadd.f32 %v274_v43, %v273_v41  ;;  %v185_v43 = vld [vmem:[%s639_s3] sm:$0x77] }
  0xbe   :  { %v592_v47 = vmul.f32 %v585_v30, %v284_v45  ;;  %v595_v48 = vmul.f32 %v587_v31, %v284_v45  ;;  %v281_v49 = vadd.f32 %v280_v44, %v279_v42  ;;  %v131_v19 = vadd.f32 %v130_v15, %v129_v11 }
  0xbf   :  { %v137_v20 = vadd.f32 %v136_v16, %v135_v12 }
  0xc0   :  { %v318_v50 = vmax.f32 %v275_v46, %v281_v49  ;;  %v132_v23 = vrot.slane %v131_v19, 1  ;;  %v288_v3 = vrot.slane %v592_v47, 4  ;;  %v294_v4 = vrot.slane %v595_v48, 4 }
  0xc2   :  { %319 = vmax.xlane.f32.xlu2 %v318_v50  ;;  %v133_v26 = vadd.f32 %v132_v23, %v131_v19  ;;  %v289_v7 = vadd.f32 %v288_v3, %v592_v47  ;;  %v295_v8 = vadd.f32 %v294_v4, %v595_v48 }
  0xc4   :  { %v290_v11 = vrot.slane %v289_v7, 2  ;;  %v296_v12 = vrot.slane %v295_v8, 2 }
  0xc6   :  { %v142_v2 = vpop.permute.xlu1 %141  ;;  %v291_v15 = vadd.f32 %v290_v11, %v289_v7 }
  0xc7   :  { %v145_v5 = vmul.f32 %v581_v59, %v142_v2  ;;  %v144_v6 = vmul.f32 %v579_v58, %v142_v2  ;;  %v138_v59 = vrot.slane %v137_v20, 1 }
  0xc9   :  { %v152_v9 = vrot.slane %v145_v5, 4  ;;  %v146_v10 = vrot.slane %v144_v6, 4  ;;  %v139_v27 = vadd.f32 %v138_v59, %v137_v20 }
  0xcb   :  { %v153_v13 = vadd.f32 %v152_v9, %v145_v5  ;;  %v147_v14 = vadd.f32 %v146_v10, %v144_v6 }
  0xcd   :  { %v154_v17 = vrot.slane %v153_v13, 2  ;;  %v148_v18 = vrot.slane %v147_v14, 2 }
  0xcf   :  { %v155_v21 = vadd.f32 %v154_v17, %v153_v13  ;;  %v149_v22 = vadd.f32 %v148_v18, %v147_v14  ;;  %v292_v18 = vrot.slane %v291_v15, 1 }
  0xd1   :  { %v156_v24 = vrot.slane %v155_v21, 1  ;;  %v150_v58 = vrot.slane %v149_v22, 1 }
  0xd3   :  { %v157_v28 = vadd.f32 %v156_v24, %v155_v21  ;;  %v151_v32 = vadd.f32 %v150_v58, %v149_v22  ;;  %v293_v21 = vadd.f32 %v292_v18, %v291_v15 }
 0x123   :  { %v160_v51 = vpop.xlane.xlu0 %159 }
 0x124   :  { %395 = vpush %v160_v51 }
 0x135   :  { %v320_v1 = vpop.xlane.xlu2 %319 }
 0x155   :  { %s396_s0 = spop %395 }
 0x156   :  { %v162_v52 = vstv %s396_s0 }
 0x157   :  { %441 = vrcp.f32 %v162_v52  ;;  %v174_v56 = vand.u32 2147483648, %v162_v52  ;;  %v172_v60 = vand.u32 2147483647, %v162_v52  ;;  %vm168_vm1 = vweird.f32 %v162_v52 }
 0x159   :  { %v175_v62 = vor.u32 1.1754944e-38, %v174_v56  ;;  %vm173_vm3 = vcmp.eq.f32.partialorder %v172_v60, 8.507059e+37 }
 0x15d   :  { %v442_v53 = vpop.eup %441 }
 0x15e   :  { %v164_v54 = vmul.f32 %v442_v53, %v162_v52  ;;  %vm169_vm0 = vweird.f32 %v442_v53 }
 0x15f   :  { %vm170_vm2 = vmor %vm168_vm1, %vm169_vm0 }
 0x160   :  { %v165_v55 = vsub.f32 1.0, %v164_v54 }
 0x162   :  { %v166_v57 = vmul.f32 %v442_v53, %v165_v55 }
 0x164   :  { %v167_v61 = vadd.f32 %v442_v53, %v166_v57 }
 0x166   :  { %v171_v63 = vsel %vm170_vm2, %v442_v53, %v167_v61 }
 0x167   :  { %v176_v0 = vsel %vm173_vm3, %v175_v62, %v171_v63 }
 0x168   :  { %397 = vpush %v176_v0  ;;  %v302_v0 = vpop.permute.xlu1 %301 }
 0x169   :  { %399 = vpush %v320_v1  ;;  %v305_v1 = vmul.f32 %v587_v31, %v302_v0  ;;  %v304_v2 = vmul.f32 %v585_v30, %v302_v0  ;;  %v297_v31 = vadd.f32 %v296_v12, %v295_v8 }
 0x16b   :  { %v312_v5 = vrot.slane %v305_v1, 4  ;;  %v306_v6 = vrot.slane %v304_v2, 4  ;;  %v298_v19 = vrot.slane %v297_v31, 1 }
 0x16d   :  { %v313_v9 = vadd.f32 %v312_v5, %v305_v1  ;;  %v307_v10 = vadd.f32 %v306_v6, %v304_v2  ;;  %v299_v22 = vadd.f32 %v298_v19, %v297_v31 }
 0x16f   :  { %v314_v13 = vrot.slane %v313_v9, 2  ;;  %v308_v14 = vrot.slane %v307_v10, 2 }
 0x171   :  { %v315_v16 = vadd.f32 %v314_v13, %v313_v9  ;;  %v309_v30 = vadd.f32 %v308_v14, %v307_v10 }
 0x173   :  { %v316_v17 = vrot.slane %v315_v16, 1  ;;  %v310_v20 = vrot.slane %v309_v30, 1 }
 0x175   :  { %v317_v23 = vadd.f32 %v316_v17, %v315_v16  ;;  %v311_v48 = vadd.f32 %v310_v20, %v309_v30 }
 0x199   :  { %s398_s30 = spop %397 }
 0x19a   :  { %v178_v29 = vstv %s398_s30  ;;  %s400_s6 = spop %399 }
 0x19b   :  { %v179_v33 = vmul.f32 %v178_v29, %v133_v26  ;;  %v180_v34 = vmul.f32 %v178_v29, %v139_v27  ;;  %v184_v35 = vmul.f32 %v178_v29, %v157_v28  ;;  %v322_v37 = vstv %s400_s6 }
 0x19c   :  { %v183_v39 = vmul.f32 %v178_v29, %v151_v32  ;;  %443 = vrcp.f32 %v322_v37  ;;  %v334_v55 = vand.u32 2147483648, %v322_v37  ;;  %v332_v57 = vand.u32 2147483647, %v322_v37  ;;  %v393_v32 = vld [vmem:[%s639_s3 + $0x8] sm:$0x77] }
 0x19d   :  { %v182_v38 = vsub.f32 1.0, %v180_v34  ;;  %v195_v40 = vrot.slane %v184_v35, 4  ;;  %v202_v41 = vrot.slane %v180_v34, 7  ;;  %v181_v42 = vsub.f32 1.0, %v179_v33 }
 0x19e   :  { %vm328_vm8 = vweird.f32 %v322_v37  ;;  %v335_v61 = vor.u32 1.1754944e-38, %v334_v55  ;;  %vm333_vm10 = vcmp.eq.f32.partialorder %v332_v57, 8.507059e+37 }
 0x19f   :  { %v188_v44 = vrot.slane %v182_v38, 4  ;;  %v196_v45 = vsel %vm189_vm4, %v183_v39, %v195_v40  ;;  %v204_v46 = vsel %vm203_vm5, %v179_v33, %v202_v41 }
 0x1a0   :  { %210 = vst.msk [vmem:[#allocation7] sm:$0x3] %vm601_vm6, %v204_v46 }
 0x1a1   :  { %v190_v49 = vsel %vm189_vm4, %v181_v42, %v188_v44 }
 0x1a2   :  { %v192_v50 = vmul.f32 %v190_v49, %v185_v43  ;;  %v444_v51 = vpop.eup %443 }
 0x1a3   :  { %v324_v53 = vmul.f32 %v444_v51, %v322_v37  ;;  %vm329_vm7 = vweird.f32 %v444_v51 }
 0x1a4   :  { %v198_v52 = vadd.f32 %v196_v45, %v192_v50  ;;  %vm330_vm9 = vmor %vm328_vm8, %vm329_vm7 }
 0x1a5   :  { %v325_v54 = vsub.f32 1.0, %v324_v53 }
 0x1a6   :  { %199 = vst [vmem:[%s640_s4] sm:$0x77] %v198_v52 }
 0x1a7   :  { %v326_v56 = vmul.f32 %v444_v51, %v325_v54 }
 0x1a9   :  { %v327_v60 = vadd.f32 %v444_v51, %v326_v56 }
 0x1ab   :  { %v331_v62 = vsel %vm330_vm9, %v444_v51, %v327_v60 }
 0x1ac   :  { %v336_v63 = vsel %vm333_vm10, %v335_v61, %v331_v62 }
 0x1ad   :  { %401 = vpush %v336_v63 }
 0x1de   :  { %s402_s11 = spop %401 }
 0x1df   :  { %v338_v47 = vstv %s402_s11 }
 0x1e0   :  { %v339_v59 = vmul.f32 %v338_v47, %v293_v21  ;;  %v340_v24 = vmul.f32 %v338_v47, %v299_v22  ;;  %v344_v58 = vmul.f32 %v338_v47, %v317_v23  ;;  %v343_v26 = vmul.f32 %v338_v47, %v311_v48 }
 0x1e2   :  { %v342_v25 = vsub.f32 1.0, %v340_v24  ;;  %v355_v27 = vrot.slane %v344_v58, 4  ;;  %v363_v28 = vrot.slane %v340_v24, 7  ;;  %v341_v29 = vsub.f32 1.0, %v339_v59 }
 0x1e4   :  { %v349_v33 = vrot.slane %v342_v25, 4  ;;  %v356_v34 = vsel %vm189_vm4, %v343_v26, %v355_v27  ;;  %v364_v35 = vsel %vm203_vm5, %v339_v59, %v363_v28 }
 0x1e5   :  { %367 = vst.msk [vmem:[#allocation7 + $0x2] sm:$0x3] %vm601_vm6, %v364_v35 }
 0x1e6   :  { %v350_v37 = vsel %vm189_vm4, %v341_v29, %v349_v33  ;;  %382 = dma.vmem_to_hbm [thread:$0]  %s375_s13, 64, %s377_s16, [#allocation4], %s535_s5, %s535_s5, %s536_s19  }
 0x1e7   :  { %v352_v38 = vmul.f32 %v393_v32, %v350_v37 }
 0x1e9   :  { %v358_v39 = vadd.f32 %v356_v34, %v352_v38 }
 0x1eb   :  { %394 = vst [vmem:[%s640_s4 + $0x8] sm:$0x77] %v358_v39 }
 0x1ec   :  { %521 = dma.done.wait [#allocation4], 64  }
 0x1ed   :  { %522 = vsyncadd [#allocation4], 4294967232 }
 0x1ee   :  { %389 = vsyncpa [#allocation3], 1 }
 0x1ef   :  { %390 = vsyncpa [#allocation6], 1 }
 0x1f0   :  { %391 = vsyncpa [#allocation4], 1 }

</bundles_post_ra>
